<compile_context>
chip_gen: v7x
topology: tpu7x:2x2x1
jax: 0.10.0
libtpu: 0.0.40
codegen_flags: <defaults>
</compile_context>

<pallas_src>
import jax
import jax.numpy as jnp
from jax.experimental import pallas as pl
from jax.experimental.pallas import tpu as pltpu


LANES = 128
# Rows must stay a multiple of 32 so the block is (8,128)/(16,128)/(32,128)
# aligned for every dtype (f32 / bf16 / int8-fp8) in a mixed-dtype call.
_SUBLANE_LCM = 32
_TARGET_BLOCK_BYTES_V7X = 4 * 1024 * 1024   # 24 MiB live << 64 MiB VMEM
_TARGET_BLOCK_BYTES_BIG = 8 * 1024 * 1024   # v5e/v6e: 48 MiB live, raise limit
_VMEM_LIMIT_BIG = 64 * 1024 * 1024


def _smask_kernel(x_ref, noisy_ref, o_ref):
    # Upcast in-register only; HBM traffic stays at each input's native width.
    x = x_ref[...].astype(jnp.float32)
    s = 1.0 / (1.0 + jnp.exp(-x))                      # exact sigmoid (bit parity)
    o_ref[...] = (s * noisy_ref[...].astype(jnp.float32)).astype(o_ref.dtype)


def _is_v7x_like():
    """Best-effort generation detection (2 TensorCores / 64 MiB VMEM per TC)."""
    try:
        kind = jax.devices()[0].device_kind.lower()
    except Exception:
        return False
    return "7" in kind


def smask_forward(x, noisy, *, target_block_bytes=None, donate_noisy=False):
    """out = sigmoid(x) * noisy.  x, noisy: same shape (dtypes may differ)."""
    assert x.shape == noisy.shape, "x and noisy must have identical shapes"

    orig_shape = x.shape
    out_dtype = jnp.result_type(x.dtype, noisy.dtype)
    n_elem = x.size

    x_item = jnp.dtype(x.dtype).itemsize
    n_item = jnp.dtype(noisy.dtype).itemsize
    o_item = jnp.dtype(out_dtype).itemsize

    # ---- flatten to a lane-dense [rows, 128] slab (pad only to 128 elems) ----
    xf = x.reshape(-1)
    nf = noisy.reshape(-1)
    n_pad = (-n_elem) % LANES
    if n_pad:  # rare path: one tiny (<128 elem) pad instead of a full-tile pad
        xf = jnp.concatenate([xf, jnp.zeros((n_pad,), x.dtype)])
        nf = jnp.concatenate([nf, jnp.zeros((n_pad,), noisy.dtype)])
    rows = (n_elem + n_pad) // LANES
    x2 = xf.reshape(rows, LANES)
    n2 = nf.reshape(rows, LANES)

    # ---- generation-gated block size (in bytes) + VMEM limit ----------------
    is_v7 = _is_v7x_like()
    if target_block_bytes is None:
        target_block_bytes = (_TARGET_BLOCK_BYTES_V7X if is_v7
                              else _TARGET_BLOCK_BYTES_BIG)
    vmem_limit = None if is_v7 else _VMEM_LIMIT_BIG

    max_item = max(x_item, n_item, o_item)
    tr = max(target_block_bytes // (LANES * max_item), _SUBLANE_LCM)
    tr = (tr // _SUBLANE_LCM) * _SUBLANE_LCM
    if tr >= rows:
        # Whole slab in one block: block_shape == full array dims is always legal.
        tr = rows
        grid = (1,)
    else:
        # tr is a multiple of 32 -> (8/16/32,128)-aligned; ragged last block is
        # masked by Pallas (pad lanes compute garbage that is never written).
        grid = (pl.cdiv(rows, tr),)

    cost = pl.CostEstimate(
        flops=4 * n_elem,
        transcendentals=n_elem,                          # one exp per element
        bytes_accessed=n_elem * (x_item + n_item + o_item),
    )

    donate = bool(donate_noisy) and jnp.dtype(noisy.dtype) == jnp.dtype(out_dtype)
    io_aliases = {1: 0} if donate else {}

    # v7x: ask for a real 2-TensorCore split (CORE_PARALLEL); plain "parallel"
    # does not shard the grid across cores.  Fall back if unsupported.
    if is_v7:
        sem_options = [(getattr(pltpu, "CORE_PARALLEL", "parallel"),), ("parallel",)]
    else:
        sem_options = [("parallel",)]

    out2 = None
    last_err = None
    for sems in sem_options:
        try:
            out2 = pl.pallas_call(
                _smask_kernel,
                out_shape=jax.ShapeDtypeStruct((rows, LANES), out_dtype),
                grid=grid,
                in_specs=[
                    pl.BlockSpec((tr, LANES), lambda i: (i, 0)),  # x slab tile
                    pl.BlockSpec((tr, LANES), lambda i: (i, 0)),  # noisy slab tile
                ],
                out_specs=pl.BlockSpec((tr, LANES), lambda i: (i, 0)),
                compiler_params=pltpu.CompilerParams(
                    dimension_semantics=sems,
                    vmem_limit_bytes=vmem_limit,
                ),
                cost_estimate=cost,
                input_output_aliases=io_aliases,
            )(x2, n2)
            break
        except Exception as e:  # e.g. CORE_PARALLEL unsupported -> retry "parallel"
            last_err = e
            out2 = None
    if out2 is None:
        raise last_err

    out = out2.reshape(-1)
    if n_pad:
        out = out[:n_elem]
    return out.reshape(orig_shape)


def smask_reference(x, noisy):
    """Pure-JAX reference (same sigmoid formulation & dtype promotion)."""
    out_dtype = jnp.result_type(x.dtype, noisy.dtype)
    s = 1.0 / (1.0 + jnp.exp(-x.astype(jnp.float32)))
    return (s * noisy.astype(jnp.float32)).astype(out_dtype)


if __name__ == "__main__":
    key = jax.random.PRNGKey(0)
    k1, k2, k3, k4, k5, k6 = jax.random.split(key, 6)

    # Test 1: NCHW activation (typical module input); 128-aligned -> zero-copy path.
    B, C, H, W = 2, 4, 16, 16
    x = 3.0 * jax.random.normal(k1, (B, C, H, W), dtype=jnp.float32)
    noisy = jax.random.normal(k2, (B, C, H, W), dtype=jnp.float32)
    out = jax.block_until_ready(smask_forward(x, noisy))
    ref = smask_reference(x, noisy)
    assert out.shape == x.shape and out.dtype == ref.dtype
    assert jnp.allclose(out, ref, atol=1e-6, rtol=1e-6), "mismatch (aligned case)"

    # Test 2: non-128-aligned flat length -> minimal (<128 elem) pad path.
    x2 = 3.0 * jax.random.normal(k3, (1, 3, 10, 7), dtype=jnp.float32)
    n2 = jax.random.normal(k4, (1, 3, 10, 7), dtype=jnp.float32)
    out2 = jax.block_until_ready(smask_forward(x2, n2))
    assert jnp.allclose(out2, smask_reference(x2, n2), atol=1e-6, rtol=1e-6), \
        "mismatch (padded case)"

    # Test 3: multi-block grid + ragged last block (small block override) with
    # mixed dtypes (bf16 mask logits, f32 noisy) -> in-kernel casts, f32 output.
    x3 = 3.0 * jax.random.normal(k5, (2, 5, 20, 128), dtype=jnp.bfloat16)
    n3 = jax.random.normal(k6, (2, 5, 20, 128), dtype=jnp.float32)
    out3 = jax.block_until_ready(smask_forward(x3, n3, target_block_bytes=64 * 1024))
    ref3 = smask_reference(x3, n3)
    assert out3.shape == x3.shape and out3.dtype == ref3.dtype
    assert jnp.allclose(out3, ref3, atol=1e-5, rtol=1e-5), "mismatch (mixed/ragged case)"

    print("KERNEL_OK")
</pallas_src>

<mosaic_0001>
module attributes {stable_mosaic.version = 11 : i64} {
  func.func @_smask_kernel(%arg0: i32, %arg1: memref<16x128xf32, #tpu.memory_space<vmem>>, %arg2: memref<16x128xf32, #tpu.memory_space<vmem>>, %arg3: memref<16x128xf32, #tpu.memory_space<vmem>>) attributes {dimension_semantics = [#tpu.dimension_semantics<parallel>], iteration_bounds = array<i64: 1>, scalar_prefetch = 0 : i64, scratch_operands = 0 : i64, tpu.core_type = #tpu.core_type<tc>, window_params = [{transform_indices = @transform_0, window_bounds = array<i64: 16, 128>}, {transform_indices = @transform_1, window_bounds = array<i64: 16, 128>}, {transform_indices = @transform_2, window_bounds = array<i64: 16, 128>}]} {
    %c0 = arith.constant 0 : index
    %c0_0 = arith.constant 0 : index
    %0 = vector.load %arg1[%c0, %c0_0] : memref<16x128xf32, #tpu.memory_space<vmem>>, vector<16x128xf32>
    %cst = arith.constant 0.000000e+00 : f32
    %1 = vector.broadcast %cst : f32 to vector<16x128xf32>
    %2 = arith.subf %1, %0 : vector<16x128xf32>
    %3 = math.exp %2 : vector<16x128xf32>
    %cst_1 = arith.constant 1.000000e+00 : f32
    %4 = vector.broadcast %cst_1 : f32 to vector<16x128xf32>
    %5 = arith.addf %4, %3 : vector<16x128xf32>
    %cst_2 = arith.constant 1.000000e+00 : f32
    %6 = vector.broadcast %cst_2 : f32 to vector<16x128xf32>
    %7 = arith.divf %6, %5 : vector<16x128xf32>
    %c0_3 = arith.constant 0 : index
    %c0_4 = arith.constant 0 : index
    %8 = vector.load %arg2[%c0_3, %c0_4] : memref<16x128xf32, #tpu.memory_space<vmem>>, vector<16x128xf32>
    %9 = arith.mulf %7, %8 : vector<16x128xf32>
    %c0_5 = arith.constant 0 : index
    %c0_6 = arith.constant 0 : index
    %10 = vector.load %arg3[%c0_5, %c0_6] : memref<16x128xf32, #tpu.memory_space<vmem>>, vector<16x128xf32>
    tpu.vector_store %arg3[%c0_5, %c0_6], %9 {strides = array<i32>} : memref<16x128xf32, #tpu.memory_space<vmem>>, vector<16x128xf32>,
    return
  }
  func.func @transform_0(%arg0: i32) -> (i32, i32) {
    %c0_i32 = arith.constant 0 : i32
    %c0_i32_0 = arith.constant 0 : i32
    return %arg0, %c0_i32 : i32, i32
  }
  func.func @transform_1(%arg0: i32) -> (i32, i32) {
    %c0_i32 = arith.constant 0 : i32
    %c0_i32_0 = arith.constant 0 : i32
    return %arg0, %c0_i32 : i32, i32
  }
  func.func @transform_2(%arg0: i32) -> (i32, i32) {
    %c0_i32 = arith.constant 0 : i32
    %c0_i32_0 = arith.constant 0 : i32
    return %arg0, %c0_i32 : i32, i32
  }
}

</mosaic_0001>

<bundles_post_ra>
// kernel: tpu_custom_call.1
= control target key start
LH: loop header
LB: loop body
LE: loop exit
PB: predicated region body
PF: predicated region fallthrough
CT: control target
= control target key end

     0   :  { %7 = vsyncpa [#allocation3], 0  ;;  %s228_s0 = inlined_call_operand.hbm [shape: f32[16,128], index: 0, kind: input, shape index: {}]   ;;  %s229_s1 = inlined_call_operand.hbm [shape: f32[16,128], index: 1, kind: input, shape index: {}]   ;;  %s230_s2 = inlined_call_operand.hbm [shape: f32[16,128], index: 2, kind: output, shape index: {}]  }
   0x1   :  { %8 = vsyncpa [#allocation6], 0 }
   0x2   :  { %9 = vsyncpa [#allocation4], 0  ;;  %s163_s9 = smov [#allocation2]   ;;  %s91_s13 = scalar_lea.hbm %s228_s0, 256 }
   0x3   :  { %s15_s10 = sshll.u32 %s163_s9, 4  ;;  %p92_p0 = scmp.ne.s32.totalorder %s228_s0, %s91_s13  ;;  %s16_s10 = int_to_ptr.vmem [resolvable:$true] %s15_s10 }
   0x4   :  { %p95_p1 = scmp.lt.u32.totalorder %s91_s13, %s228_s0 }
   0x6   :  { %p97_p2 = pnand %p95_p1, %p92_p0 }
   0x8   :  { %100 = shalt.err (!%p97_p2)
}
   0x9   :  { %s101_s18 = scalar_lea.vmem %s16_s10, 256  ;;  %p106_p4 = scmp.lt.s32.totalorder %s16_s10, %s16_s10 }
   0xa   :  { %p102_p3 = scmp.ne.s32.totalorder %s16_s10, %s101_s18  ;;  %p107_p5 = scmp.lt.s32.totalorder %s101_s18, %s101_s18 }
   0xc   :  { %p108_p6 = por %p107_p5, %p106_p4 }
   0xe   :  { %p109_p7 = pnand %p108_p6, %p102_p3 }
  0x10   :  { %112 = shalt.err (!%p109_p7)
}
  0x11   :  { %s164_s19 = smov 128   ;;  %s165_s20 = smov 8  }
  0x12   :  { %21 = dma.hbm_to_vmem [thread:$0]  %s228_s0, 256, %s16_s10, [#allocation3], %s164_s19, %s164_s19, %s165_s20  }
  0x13   :  { %s166_s23 = smov [#allocation5]   ;;  %s113_s27 = scalar_lea.hbm %s229_s1, 256 }
  0x14   :  { %s27_s24 = sshll.u32 %s166_s23, 4  ;;  %p114_p8 = scmp.ne.s32.totalorder %s229_s1, %s113_s27  ;;  %s28_s24 = int_to_ptr.vmem [resolvable:$true] %s27_s24 }
  0x15   :  { %p117_p9 = scmp.lt.u32.totalorder %s113_s27, %s229_s1 }
  0x17   :  { %p119_p10 = pnand %p117_p9, %p114_p8 }
  0x19   :  { %122 = shalt.err (!%p119_p10)
}
  0x1a   :  { %s123_s4 = scalar_lea.vmem %s28_s24, 256  ;;  %p128_p12 = scmp.lt.s32.totalorder %s28_s24, %s28_s24 }
  0x1b   :  { %p124_p11 = scmp.ne.s32.totalorder %s28_s24, %s123_s4  ;;  %p129_p13 = scmp.lt.s32.totalorder %s123_s4, %s123_s4 }
  0x1d   :  { %p130_p0 = por %p129_p13, %p128_p12 }
  0x1f   :  { %p131_p1 = pnand %p130_p0, %p124_p11 }
  0x21   :  { %134 = shalt.err (!%p131_p1)
}
  0x22   :  { %33 = dma.hbm_to_vmem [thread:$0]  %s229_s1, 256, %s28_s24, [#allocation6], %s164_s19, %s164_s19, %s165_s20  }
  0x23   :  { %157 = dma.done.wait [#allocation3], 256  }
  0x24   :  { %158 = vsyncadd [#allocation3], 4294967040 }
  0x25   :  { %159 = dma.done.wait [#allocation6], 256  }
  0x26   :  { %160 = vsyncadd [#allocation6], 4294967040  ;;  %v40_v0 = vld [vmem:[#allocation2] sm:$0xff]  ;;  %v41_v1 = vld [vmem:[#allocation2 + $0x8] sm:$0xff]  ;;  %s167_s1 = smov [#allocation7]  }
  0x27   :  { %v42_v2 = vsub.f32 0.0, %v40_v0  ;;  %v43_v3 = vsub.f32 0.0, %v41_v1  ;;  %v54_v10 = vld [vmem:[#allocation5] sm:$0xff]  ;;  %v55_v11 = vld [vmem:[#allocation5 + $0x8] sm:$0xff]  ;;  %s65_s6 = sshll.u32 %s167_s1, 4  ;;  %s66_s6 = int_to_ptr.vmem [resolvable:$true] %s65_s6 }
  0x28   :  { %s135_s7 = scalar_lea.vmem %s66_s6, 256  ;;  %p140_p3 = scmp.lt.s32.totalorder %s66_s6, %s66_s6 }
  0x29   :  { %v44_v4 = vmul.f32 1.442695, %v42_v2  ;;  %v46_v5 = vmul.f32 1.442695, %v43_v3  ;;  %p136_p2 = scmp.ne.s32.totalorder %s66_s6, %s135_s7  ;;  %p141_p4 = scmp.lt.s32.totalorder %s135_s7, %s135_s7 }
  0x2b   :  { %83 = vpow2.f32 %v44_v4  ;;  %p142_p5 = por %p141_p4, %p140_p3 }
  0x2c   :  { %85 = vpow2.f32 %v46_v5 }
  0x2d   :  { %p143_p6 = pnand %p142_p5, %p136_p2 }
  0x35   :  { %v84_v6 = vpop.eup %83 }
  0x36   :  { %v86_v7 = vpop.eup %85  ;;  %v48_v8 = vadd.f32 1.0, %v84_v6 }
  0x37   :  { %v49_v9 = vadd.f32 1.0, %v86_v7 }
  0x38   :  { %87 = vrcp.f32 %v48_v8 }
  0x39   :  { %89 = vrcp.f32 %v49_v9 }
  0x42   :  { %v88_v12 = vpop.eup %87 }
  0x43   :  { %v90_v13 = vpop.eup %89  ;;  %v56_v14 = vmul.f32 %v88_v12, %v54_v10 }
  0x44   :  { %v57_v15 = vmul.f32 %v90_v13, %v55_v11 }
  0x45   :  { %58 = vst [vmem:[#allocation7] sm:$0xff] %v56_v14 }
  0x46   :  { %59 = vst [vmem:[#allocation7 + $0x8] sm:$0xff] %v57_v15 }
  0x47   :  { %146 = shalt.err (!%p143_p6)
}
  0x48   :  { %s147_s10 = scalar_lea.hbm %s230_s2, 256 }
  0x49   :  { %p148_p7 = scmp.ne.s32.totalorder %s230_s2, %s147_s10  ;;  %p151_p8 = scmp.lt.u32.totalorder %s147_s10, %s230_s2 }
  0x4b   :  { %p153_p9 = pnand %p151_p8, %p148_p7 }
  0x4d   :  { %156 = shalt.err (!%p153_p9)
}
  0x4e   :  { %71 = dma.vmem_to_hbm [thread:$0]  %s66_s6, 256, %s230_s2, [#allocation4], %s164_s19, %s164_s19, %s165_s20  }
  0x4f   :  { %161 = dma.done.wait [#allocation4], 256  }
  0x50   :  { %162 = vsyncadd [#allocation4], 4294967040 }
  0x51   :  { %75 = vsyncpa [#allocation3], 1 }
  0x52   :  { %76 = vsyncpa [#allocation6], 1 }
  0x53   :  { %77 = vsyncpa [#allocation4], 1 }

</bundles_post_ra>
